<compile_context>
chip_gen: v5e
topology: v5e:2x2
jax: 0.10.0
libtpu: 0.0.40
codegen_flags: <defaults>
</compile_context>

<pallas_src>
import jax
import jax.numpy as jnp
from jax.experimental import pallas as pl
from jax.experimental.pallas import tpu as pltpu

_LANE = 128
_VMEM_BUDGET = 48 << 20  # keep tiles under this so they fit v7x's 64 MiB VMEM


def _round_up(x, m):
    return ((x + m - 1) // m) * m


def _memory_selector_kernel(b2_ref, mem_ref, w1m_ref, qbw2_ref, out_ref):
    # b2_ref   : (1,)       SMEM  fc2 bias scalar
    # mem_ref  : (TM, E)    VMEM  bf16 streaming memory-embedding tile
    # w1m_ref  : (E, H)     VMEM  bf16 memory half of fc1 weight (grid-resident)
    # qbw2_ref : (2, H)     VMEM  f32 row0 = q @ w1_q + b1, row1 = fc2 weight
    # out_ref  : (1, TM)    VMEM  lane-dense logits row for this tile

    # hidden = relu(mem @ w1_m + (q @ w1_q + b1)); bf16 inputs, f32 accumulate.
    h = jnp.dot(mem_ref[...], w1m_ref[...], preferred_element_type=jnp.float32)
    h = jnp.maximum(h + qbw2_ref[0:1, :], 0.0)                  # (TM, H) f32

    # fc2 as a 1-row A @ B.T: (1, H) . (TM, H)^T -> (1, TM)  (lane-dense).
    logits = jax.lax.dot_general(
        qbw2_ref[1:2, :], h,
        dimension_numbers=(((1,), (1,)), ((), ())),
        preferred_element_type=jnp.float32) + b2_ref[0]
    out_ref[...] = logits.astype(out_ref.dtype)


def _choose_tile(M, E, H, tile_m):
    """Pick a lane-aligned tile size that (a) gives >= 2 grid steps and
    (b) fits the per-generation VMEM budget (counting the f32 hidden)."""
    tile_m = max(_LANE, _round_up(tile_m, _LANE))
    tm = min(tile_m, _round_up(-(-M // 2), _LANE))   # >= 2 grid steps
    tm = max(tm, _LANE)

    def budget(t):
        return (2 * t * E * 2          # double-buffered bf16 mem tiles
                + 2 * E * H * 2        # resident bf16 w1_m (2 bufs)
                + 2 * 2 * H * 4        # (2, H) q_bias / w2 rows
                + 2 * t * 4            # (1, t) f32 output blocks
                + t * H * 4            # f32 hidden intermediate
                + (2 << 20))           # slack / compiler internal scratch

    while tm > _LANE and budget(tm) > _VMEM_BUDGET:
        tm = max(_LANE, _round_up(tm // 2, _LANE))
    return tm, budget(tm)


def memory_selector_forward(query_embedding, memory_embeddings,
                            w1, b1, w2, b2, *, tile_m=1024,
                            min_pallas_rows=256):
    """
    query_embedding:   (E,)   float32
    memory_embeddings: (M, E) float32
    w1: (2E, H), b1: (H,)   -- fc1 (stored transposed vs. PyTorch (H, 2E))
    w2: (H, 1),  b2: (1,)   -- fc2 (stored transposed vs. PyTorch (1, H))
    Returns logits: (M,)
    """
    M, E = memory_embeddings.shape
    H = w1.shape[1]

    # Tiny / overhead-bound regime: a fused XLA dot beats pallas_call overhead.
    if M <= min_pallas_rows:
        q_exp = jnp.broadcast_to(
            query_embedding.astype(jnp.float32)[None, :], (M, E))
        combined = jnp.concatenate(
            [q_exp, memory_embeddings.astype(jnp.float32)], axis=1)
        x = jnp.maximum(combined @ w1 + b1, 0.0)
        return (x @ w2 + b2).reshape(M)

    # Hoist the grid-constant query path into a fused (1, H) bias (f32).
    q_bias = (query_embedding.reshape(1, E).astype(jnp.float32)
              @ w1[:E, :].astype(jnp.float32)
              + b1.reshape(1, H).astype(jnp.float32))             # (1, H)
    w2_row = w2.reshape(1, H).astype(jnp.float32)                 # (1, H)
    qb_w2 = jnp.concatenate([q_bias, w2_row], axis=0)             # (2, H) f32
    b2_s = b2.reshape(1).astype(jnp.float32)                      # SMEM scalar

    # Stream the big operands as bf16 (f32 accumulation in-kernel).
    mem_bf16 = memory_embeddings.astype(jnp.bfloat16)             # (M, E)
    w1_m = w1[E:, :].astype(jnp.bfloat16)                         # (E, H)
    # TODO(synk): at real sizes pad H to a multiple of 128 (and E to >= 8/128)
    # for full MXU/VPU lane utilization; toy shapes use full-dim blocks.

    tm, vmem_need = _choose_tile(M, E, H, tile_m)
    grid_m = pl.cdiv(M, tm)
    padded_m = grid_m * tm

    cost = pl.CostEstimate(
        flops=2 * M * E * H + 2 * M * H + M * H,
        transcendentals=0,
        bytes_accessed=2 * M * E + 2 * E * H + 4 * (2 * H + 1) + 4 * M,
    )

    out = pl.pallas_call(
        _memory_selector_kernel,
        out_shape=jax.ShapeDtypeStruct((1, padded_m), jnp.float32),
        grid=(grid_m,),
        in_specs=[
            pl.BlockSpec(memory_space=pltpu.MemorySpace.SMEM),    # b2 scalar
            pl.BlockSpec((tm, E), lambda i: (i, 0)),              # mem tile
            pl.BlockSpec((E, H), lambda i: (0, 0)),               # w1_m resident
            pl.BlockSpec((2, H), lambda i: (0, 0)),               # q_bias / w2
        ],
        out_specs=pl.BlockSpec((1, tm), lambda i: (0, i)),        # lane-dense row
        compiler_params=pltpu.CompilerParams(
            dimension_semantics=("parallel",),                    # v7x: 2 TCs
            vmem_limit_bytes=int(min(max(2 * vmem_need, 32 << 20), 60 << 20))),
        cost_estimate=cost,
    )(b2_s, mem_bf16, w1_m, qb_w2)

    # Tail positions (>= M) were computed from padded/garbage rows; drop them.
    return out[0, :M]


def _reference_forward(query_embedding, memory_embeddings, w1, b1, w2, b2):
    M, E = memory_embeddings.shape
    q_exp = jnp.broadcast_to(query_embedding[None, :], (M, E))
    combined = jnp.concatenate([q_exp, memory_embeddings], axis=1)   # (M, 2E)
    x = jnp.maximum(combined @ w1 + b1, 0.0)                          # (M, H)
    logits = (x @ w2 + b2).squeeze(-1)                                # (M,)
    return logits


def _make_params(key, embed_dim, hidden_dim, M):
    k_q, k_m, k_w1, k_b1, k_w2, k_b2 = jax.random.split(key, 6)
    query = jax.random.normal(k_q, (embed_dim,), dtype=jnp.float32)
    memories = jax.random.normal(k_m, (M, embed_dim), dtype=jnp.float32)
    lim1 = 1.0 / jnp.sqrt(jnp.float32(embed_dim * 2))
    w1 = jax.random.uniform(k_w1, (embed_dim * 2, hidden_dim),
                            minval=-lim1, maxval=lim1, dtype=jnp.float32)
    b1 = jax.random.uniform(k_b1, (hidden_dim,),
                            minval=-lim1, maxval=lim1, dtype=jnp.float32)
    lim2 = 1.0 / jnp.sqrt(jnp.float32(hidden_dim))
    w2 = jax.random.uniform(k_w2, (hidden_dim, 1),
                            minval=-lim2, maxval=lim2, dtype=jnp.float32)
    b2 = jax.random.uniform(k_b2, (1,),
                            minval=-lim2, maxval=lim2, dtype=jnp.float32)
    return query, memories, w1, b1, w2, b2


if __name__ == "__main__":
    embed_dim = 32
    hidden_dim = 32

    # Case 1: tiny M (module's nominal usage) -> fused XLA path, f32 exact.
    q, mem, w1, b1, w2, b2 = _make_params(
        jax.random.PRNGKey(0), embed_dim, hidden_dim, M=8)
    logits = memory_selector_forward(q, mem, w1, b1, w2, b2)
    jax.block_until_ready(logits)
    ref = _reference_forward(q, mem, w1, b1, w2, b2)
    assert logits.shape == (8,)
    assert jnp.allclose(logits, ref, atol=1e-5, rtol=1e-5), (logits, ref)

    # Case 2: large non-divisible M -> Pallas kernel, 2-step grid, tail tile
    # discarded by the wrapper slice. Tolerance accounts for bf16 streaming.
    q2, mem2, w1_2, b1_2, w2_2, b2_2 = _make_params(
        jax.random.PRNGKey(0), embed_dim, hidden_dim, M=1000)
    logits2 = memory_selector_forward(q2, mem2, w1_2, b1_2, w2_2, b2_2)
    jax.block_until_ready(logits2)
    ref2 = _reference_forward(q2, mem2, w1_2, b1_2, w2_2, b2_2)
    assert logits2.shape == (1000,)
    assert jnp.allclose(logits2, ref2, atol=2e-2, rtol=2e-2)

    # Case 3: M an exact multiple of the tile -> no tail path, 2-step grid.
    q3, mem3, w1_3, b1_3, w2_3, b2_3 = _make_params(
        jax.random.PRNGKey(1), embed_dim, hidden_dim, M=1024)
    logits3 = memory_selector_forward(q3, mem3, w1_3, b1_3, w2_3, b2_3)
    jax.block_until_ready(logits3)
    ref3 = _reference_forward(q3, mem3, w1_3, b1_3, w2_3, b2_3)
    assert logits3.shape == (1024,)
    assert jnp.allclose(logits3, ref3, atol=2e-2, rtol=2e-2)

    print("KERNEL_OK")
</pallas_src>

<mosaic_0001>
module attributes {stable_mosaic.version = 11 : i64} {
  func.func @_memory_selector_kernel(%arg0: i32, %arg1: memref<1xf32, #tpu.memory_space<smem>>, %arg2: memref<512x32xbf16, #tpu.memory_space<vmem>>, %arg3: memref<32x32xbf16, #tpu.memory_space<vmem>>, %arg4: memref<2x32xf32, #tpu.memory_space<vmem>>, %arg5: memref<1x512xf32, #tpu.memory_space<vmem>>) attributes {dimension_semantics = [#tpu.dimension_semantics<parallel>], iteration_bounds = array<i64: 2>, scalar_prefetch = 0 : i64, scratch_operands = 0 : i64, tpu.core_type = #tpu.core_type<tc>, window_params = [{transform_indices = @transform_0, window_bounds = array<i64: 1>}, {transform_indices = @transform_1, window_bounds = array<i64: 512, 32>}, {pipeline_mode = #tpu.pipeline_mode<synchronous>, transform_indices = @transform_2, window_bounds = array<i64: 32, 32>}, {pipeline_mode = #tpu.pipeline_mode<synchronous>, transform_indices = @transform_3, window_bounds = array<i64: 2, 32>}, {transform_indices = @transform_4, window_bounds = array<i64: 1, 512>}]} {
    %c0 = arith.constant 0 : index
    %c0_0 = arith.constant 0 : index
    %0 = vector.load %arg2[%c0, %c0_0] : memref<512x32xbf16, #tpu.memory_space<vmem>>, vector<512x32xbf16>
    %c0_1 = arith.constant 0 : index
    %c0_2 = arith.constant 0 : index
    %1 = vector.load %arg3[%c0_1, %c0_2] : memref<32x32xbf16, #tpu.memory_space<vmem>>, vector<32x32xbf16>
    %cst = arith.constant dense<0.000000e+00> : vector<512x32xf32>
    %2 = tpu.matmul %0, %1, %cst {dimension_numbers = #tpu.dot_dimension_numbers<[1], [0], [0], [1], [0, 0, 1, 1], [], []>} : vector<512x32xbf16>, vector<32x32xbf16>, vector<512x32xf32> -> vector<512x32xf32>
    %c0_3 = arith.constant 0 : index
    %c0_4 = arith.constant 0 : index
    %3 = vector.load %arg4[%c0_3, %c0_4] : memref<2x32xf32, #tpu.memory_space<vmem>>, vector<1x32xf32>
    %4 = vector.broadcast %3 : vector<1x32xf32> to vector<512x32xf32>
    %5 = arith.addf %2, %4 : vector<512x32xf32>
    %cst_5 = arith.constant 0.000000e+00 : f32
    %6 = vector.broadcast %cst_5 : f32 to vector<512x32xf32>
    %7 = arith.maximumf %5, %6 : vector<512x32xf32>
    %c1 = arith.constant 1 : index
    %c0_6 = arith.constant 0 : index
    %8 = vector.load %arg4[%c1, %c0_6] : memref<2x32xf32, #tpu.memory_space<vmem>>, vector<1x32xf32>
    %cst_7 = arith.constant dense<0.000000e+00> : vector<1x512xf32>
    %9 = tpu.matmul %8, %7, %cst_7 {dimension_numbers = #tpu.dot_dimension_numbers<[1], [1], [0], [0], [0, 0, 1, 0], [], []>} : vector<1x32xf32>, vector<512x32xf32>, vector<1x512xf32> -> vector<1x512xf32>
    %c0_8 = arith.constant 0 : index
    %10 = memref.load %arg1[%c0_8] : memref<1xf32, #tpu.memory_space<smem>>
    %11 = vector.broadcast %10 : f32 to vector<1x512xf32>
    %12 = arith.addf %9, %11 : vector<1x512xf32>
    %c0_9 = arith.constant 0 : index
    %c0_10 = arith.constant 0 : index
    %13 = vector.load %arg5[%c0_9, %c0_10] : memref<1x512xf32, #tpu.memory_space<vmem>>, vector<1x512xf32>
    tpu.vector_store %arg5[%c0_9, %c0_10], %12 {strides = array<i32>} : memref<1x512xf32, #tpu.memory_space<vmem>>, vector<1x512xf32>,
    return
  }
  func.func @transform_0(%arg0: i32) -> i32 {
    %c0_i32 = arith.constant 0 : i32
    %c0_i32_0 = arith.constant 0 : i32
    return %c0_i32 : i32
  }
  func.func @transform_1(%arg0: i32) -> (i32, i32) {
    %c0_i32 = arith.constant 0 : i32
    %c0_i32_0 = arith.constant 0 : i32
    return %arg0, %c0_i32 : i32, i32
  }
  func.func @transform_2(%arg0: i32) -> (i32, i32) {
    %c0_i32 = arith.constant 0 : i32
    %c0_i32_0 = arith.constant 0 : i32
    %c0_i32_1 = arith.constant 0 : i32
    return %c0_i32, %c0_i32_0 : i32, i32
  }
  func.func @transform_3(%arg0: i32) -> (i32, i32) {
    %c0_i32 = arith.constant 0 : i32
    %c0_i32_0 = arith.constant 0 : i32
    %c0_i32_1 = arith.constant 0 : i32
    return %c0_i32, %c0_i32_0 : i32, i32
  }
  func.func @transform_4(%arg0: i32) -> (i32, i32) {
    %c0_i32 = arith.constant 0 : i32
    %c0_i32_0 = arith.constant 0 : i32
    return %c0_i32, %arg0 : i32, i32
  }
}

</mosaic_0001>

<bundles_post_ra>
// kernel: tpu_custom_call.1
= control target key start
LH: loop header
LB: loop body
LE: loop exit
PB: predicated region body
PF: predicated region fallthrough
CT: control target
= control target key end

     0   :  { %s1986_s0 = inlined_call_operand.<no memory space> [shape: f32[1], index: 0, kind: input, shape index: {}]   ;;  %s1987_s1 = inlined_call_operand.vmem [shape: bf16[1000,32], index: 1, kind: input, shape index: {}]   ;;  %s1988_s2 = inlined_call_operand.vmem [shape: bf16[32,32], index: 2, kind: input, shape index: {}]   ;;  %s1989_s3 = inlined_call_operand.vmem [shape: f32[2,32], index: 3, kind: input, shape index: {}]   ;;  %s1990_s4 = inlined_call_operand.hbm [shape: f32[1,1024], index: 4, kind: output, shape index: {}]  }
   0x1   :  { %9 = sst [smem:[#allocation2]] %s1986_s0 }
   0x2   :  { %10 = vsyncpa [#allocation4], 0 }
   0x3   :  { %12 = vsyncpa [#allocation4 + $0x1], 0  ;;  %s1582_s17 = smov 0   ;;  %s1584_s18 = smov 0  }
   0x4   :  { %s1586_s19 = smov 0   ;;  %s1588_s20 = smov 0  }
   0x5 LB: > { %s1603_s0 = sadd.s32 4294967295, %s1552_s20   ;;  %s1165_s21 = sadd.s32 4294967294, %s1552_s20   ;;  %s1552_s20 = sphi %s1588_s20, %s1996_s20   ;;  %s1548_s19 = sphi %s1586_s19, %s1995_s19   ;;  %s1544_s18 = sphi %s1584_s18, %s1994_s18   ;;  %s1540_s17 = sphi %s1582_s17, %s1993_s17  }
   0x6   : > { %s1607_s22 = sadd.s32 1, %s1552_s20   ;;  %s114_s23 = sadd.s32 1, %s1548_s19 }
   0x7   : > { %s111_s24 = ssub.s32 %s1552_s20, %s1607_s22  ;;  %p124_p0 = scmp.ne.s32.totalorder %s1548_s19, %s1544_s18 }
   0x8   : > { %p112_p1 = scmp.eq.s32.totalorder %s111_s24, 0  ;;  %p125_p2 = scmp.eq.s32.totalorder %s1603_s0, 1 }
   0x9   : > { %p130_p3 = scmp.ne.s32.totalorder %s1544_s18, %s1540_s17  ;;  %p131_p4 = scmp.eq.s32.totalorder %s1165_s21, 1 }
   0xa   : > { %s1618_s25 = scalar_select %p112_p1, %s1548_s19, %s114_s23  }
   0xb   : > { %p1620_p5 = por %p125_p2, %p124_p0  ;;  %p1624_p6 = por %p131_p4, %p130_p3 }
   0xc   : > { %p1168_p7 = scmp.ge.s32.totalorder %s1552_s20, 1  ;;  %p175_p8 = scmp.lt.s32.totalorder %s1552_s20, 3 }
   0xe   : > { %p176_p9 = pnand %p1168_p7, %p175_p8 }
   0xf   : > { %s1170_s30 = sshll.u32 (!%p176_p9), %s1603_s0, 6  ;;  %s794_s15 = sld [smem:[#allocation2]] (!%p176_p9) }
  0x10   : > { %179 = sbr.rel (%p176_p9) target bundleno = 541 (0x21d), region = 36  ;;  %p210_p10 = scmp.lt.s32.totalorder (!%p176_p9), %s1170_s30, 124 }
  0x11   : > { %s202_s16 = sand.u32 (!%p176_p9), 1, %s1544_s18   ;;  %s1409_s23 = sshll.u32 (!%p176_p9), %s1603_s0, 2 }
  0x12   : > { %s1169_s21 = sshll.u32 (!%p176_p9), %s202_s16, 2  ;;  %s1101_s29 = scalar_lea.hbm (!%p176_p9), %s1990_s4, %s1409_s23 }
  0x13   : > { %s1105_s6 = sshll.u32 (!%p176_p9), %s1101_s29, 4  ;;  %s1091_s0 = scalar_lea.sflag (!%p176_p9), [#allocation4], %s202_s16  ;;  %s1106_s6 = int_to_ptr.hbm [resolvable:$true] %s1105_s6 }
  0x14   : > { %s1510_s11 = scalar_lea.hbm (!%p176_p9), %s1990_s4, 8 }
  0x15   : > { %v1445_v0 = vld [vmem:[%s1988_s2 + $0x8] sm:$0xff]  ;;  %v1444_v1 = vld [vmem:[%s1988_s2] sm:$0xff]  ;;  %s1998_s30 = smov (!%p210_p10, %s1170_s30), 124  ;;  %vm463_vm0 = vcmask 261120   ;;  %vm1078_vm1 = vcmask 1040384   ;;  %vm1080_vm2 = vcmask 1042434  }
  0x16   : > { %566 = vmatpush.bf16.msra.mxu0 %v1445_v0  ;;  %1446 = vmatpush.bf16.msra.mxu2 %v1445_v0  ;;  %s1171_s7 = sshll.u32 %s1998_s30, 2  ;;  %v1717_v42 = vld [vmem:[%s1989_s3] ss:$0 sm:$0xff]  ;;  %s204_s30 = scalar_lea.vmem [#allocation3], %s1169_s21  ;;  %vm1082_vm3 = vcmask 1041408  }
  0x17   : > { %1447 = vmatpush.bf16.msra.mxu3 %v1445_v0  ;;  %s1640_s10 = scalar_lea.vmem %s1987_s1, %s1171_s7  ;;  %s1103_s5 = sshll.u32 %s204_s30, 4  ;;  %s1104_s5 = int_to_ptr.vmem [resolvable:$true] %s1103_s5 }
  0x18   : > { %v1412_v2 = vld [vmem:[%s1640_s10] sm:$0xff]  ;;  %v1434_v4 = vld [vmem:[%s1640_s10 + $0xb0] sm:$0xff]  ;;  %v1413_v5 = vld [vmem:[%s1640_s10 + $0x8] sm:$0xff]  ;;  %s1504_s7 = sshra.s32 %s1106_s6, 4  ;;  %s1505_s7 = int_to_ptr.hbm [resolvable:$true] %s1504_s7 }
  0x19   : > { %v1424_v3 = vld [vmem:[%s1640_s10 + $0x60] sm:$0xff]  ;;  %v1425_v6 = vld [vmem:[%s1640_s10 + $0x68] sm:$0xff]  ;;  %v1435_v7 = vld [vmem:[%s1640_s10 + $0xb8] sm:$0xff]  ;;  %s1506_s8 = scalar_lea.hbm %s1505_s7, 4  ;;  %p1511_p0 = scmp.lt.s32.totalorder %s1505_s7, %s1990_s4 }
  0x1a   : > { %567 = vmatpush.bf16.msra.mxu0 %v1444_v1  ;;  %1448 = vmatpush.bf16.msra.mxu2 %v1444_v1  ;;  %v1414_v8 = vld [vmem:[%s1640_s10 + $0x10] sm:$0xff]  ;;  %v1436_v10 = vld [vmem:[%s1640_s10 + $0xc0] sm:$0xff]  ;;  %v1415_v11 = vld [vmem:[%s1640_s10 + $0x18] sm:$0xff]  ;;  %p1507_p11 = scmp.ne.s32.totalorder %s1505_s7, %s1506_s8  ;;  %p1512_p1 = scmp.lt.s32.totalorder %s1510_s11, %s1506_s8 }
  0x1b   : > { %1449 = vmatpush.bf16.msra.mxu3 %v1444_v1  ;;  %v1426_v9 = vld [vmem:[%s1640_s10 + $0x70] sm:$0xff]  ;;  %v1427_v12 = vld [vmem:[%s1640_s10 + $0x78] sm:$0xff]  ;;  %v1437_v13 = vld [vmem:[%s1640_s10 + $0xc8] sm:$0xff] }
  0x1c   : > { %v1416_v14 = vld [vmem:[%s1640_s10 + $0x20] sm:$0xff]  ;;  %v1438_v16 = vld [vmem:[%s1640_s10 + $0xd0] sm:$0xff]  ;;  %v1417_v17 = vld [vmem:[%s1640_s10 + $0x28] sm:$0xff]  ;;  %p1508_p12 = pnand %p1507_p11, %p1620_p5  ;;  %p1513_p2 = por %p1512_p1, %p1511_p0 }
  0x1d   : > { %1308 = vmatmul.msk.bf16.vlgmr.msra.gmra.mxu0 %vm463_vm0, %v1412_v2  ;;  %1320 = vmatmul.msk.bf16.vlgmr.msra.gmra.mxu2 %vm463_vm0, %v1424_v3  ;;  %v1428_v15 = vld [vmem:[%s1640_s10 + $0x80] sm:$0xff]  ;;  %v1429_v18 = vld [vmem:[%s1640_s10 + $0x88] sm:$0xff]  ;;  %v1439_v19 = vld [vmem:[%s1640_s10 + $0xd8] sm:$0xff] }
  0x1e   : > { %1330 = vmatmul.msk.bf16.vlgmr.msra.gmra.mxu3 %vm463_vm0, %v1434_v4  ;;  %v1418_v20 = vld [vmem:[%s1640_s10 + $0x30] sm:$0xff]  ;;  %v1440_v22 = vld [vmem:[%s1640_s10 + $0xe0] sm:$0xff]  ;;  %v1419_v23 = vld [vmem:[%s1640_s10 + $0x38] sm:$0xff]  ;;  %p1509_p13 = pneg %p1508_p12 }
  0x1f   : > { %v1430_v21 = vld [vmem:[%s1640_s10 + $0x90] sm:$0xff]  ;;  %v1431_v24 = vld [vmem:[%s1640_s10 + $0x98] sm:$0xff]  ;;  %v1441_v25 = vld [vmem:[%s1640_s10 + $0xe8] sm:$0xff] }
  0x20   : > { %v1420_v26 = vld [vmem:[%s1640_s10 + $0x40] sm:$0xff]  ;;  %v1442_v29 = vld [vmem:[%s1640_s10 + $0xf0] sm:$0xff]  ;;  %v1421_v34 = vld [vmem:[%s1640_s10 + $0x48] sm:$0xff]  ;;  %p1514_p3 = pnand %p1513_p2, %p1509_p13 }
  0x21   : > { %v1432_v27 = vld [vmem:[%s1640_s10 + $0xa0] sm:$0xff]  ;;  %v1433_v35 = vld [vmem:[%s1640_s10 + $0xa8] sm:$0xff]  ;;  %v1443_v38 = vld [vmem:[%s1640_s10 + $0xf8] sm:$0xff] }
  0x22   : > { %v1422_v44 = vld [vmem:[%s1640_s10 + $0x50] sm:$0xff]  ;;  %v1423_v59 = vld [vmem:[%s1640_s10 + $0x58] sm:$0xff] }
  0x2d   : > { %1309 = vmatmul.msk.bf16.gmra.mxu0 %vm463_vm0, %v1413_v5  ;;  %1321 = vmatmul.msk.bf16.gmra.mxu2 %vm463_vm0, %v1425_v6 }
  0x2e   : > { %1331 = vmatmul.msk.bf16.gmra.mxu3 %vm463_vm0, %v1435_v7 }
  0x3d   : > { %1310 = vmatmul.msk.bf16.gmra.mxu0 %vm463_vm0, %v1414_v8  ;;  %1322 = vmatmul.msk.bf16.gmra.mxu2 %vm463_vm0, %v1426_v9 }
  0x3e   : > { %1332 = vmatmul.msk.bf16.gmra.mxu3 %vm463_vm0, %v1436_v10 }
  0x4d   : > { %1311 = vmatmul.msk.bf16.gmra.mxu0 %vm463_vm0, %v1415_v11  ;;  %1323 = vmatmul.msk.bf16.gmra.mxu2 %vm463_vm0, %v1427_v12 }
  0x4e   : > { %1333 = vmatmul.msk.bf16.gmra.mxu3 %vm463_vm0, %v1437_v13 }
  0x5d   : > { %1312 = vmatmul.msk.bf16.gmra.mxu0 %vm463_vm0, %v1416_v14  ;;  %1324 = vmatmul.msk.bf16.gmra.mxu2 %vm463_vm0, %v1428_v15 }
  0x5e   : > { %1334 = vmatmul.msk.bf16.gmra.mxu3 %vm463_vm0, %v1438_v16 }
  0x6d   : > { %1313 = vmatmul.msk.bf16.gmra.mxu0 %vm463_vm0, %v1417_v17  ;;  %1325 = vmatmul.msk.bf16.gmra.mxu2 %vm463_vm0, %v1429_v18 }
  0x6e   : > { %1335 = vmatmul.msk.bf16.gmra.mxu3 %vm463_vm0, %v1439_v19 }
  0x7d   : > { %1314 = vmatmul.msk.bf16.gmra.mxu0 %vm463_vm0, %v1418_v20  ;;  %1326 = vmatmul.msk.bf16.gmra.mxu2 %vm463_vm0, %v1430_v21 }
  0x7e   : > { %1336 = vmatmul.msk.bf16.gmra.mxu3 %vm463_vm0, %v1440_v22 }
  0x8d   : > { %1315 = vmatmul.msk.bf16.gmra.mxu0 %vm463_vm0, %v1419_v23  ;;  %1327 = vmatmul.msk.bf16.gmra.mxu2 %vm463_vm0, %v1431_v24 }
  0x8e   : > { %1337 = vmatmul.msk.bf16.gmra.mxu3 %vm463_vm0, %v1441_v25 }
  0x9a   : > { %v1692_v28 = vpop.f32.mrf.mxu0 }
  0x9d   : > { %1316 = vmatmul.msk.bf16.gmra.mxu0 %vm463_vm0, %v1420_v26  ;;  %1328 = vmatmul.msk.bf16.gmra.mxu2 %vm463_vm0, %v1432_v27 }
  0x9e   : > { %1338 = vmatmul.msk.bf16.gmra.mxu3 %vm463_vm0, %v1442_v29 }
  0xa0   : > { %v1698_v30 = vpop.f32.mrf.mxu2 }
  0xa1   : > { %v679_v31 = vpop.f32.mrf.mxu3  ;;  %v630_v26 = vadd.f32 %v1717_v42, %v1698_v30 }
  0xa2   : > { %v1700_v32 = vpop.f32.mrf.mxu0  ;;  %v680_v55 = vadd.f32 %v1717_v42, %v679_v31 }
  0xa3   : > { %v753_v29 = vmax.f32 %v630_v26, 0.0 }
  0xa4   : > { %v773_v57 = vmax.f32 %v680_v55, 0.0 }
  0xa8   : > { %v1702_v33 = vpop.f32.mrf.mxu2 }
  0xa9   : > { %v681_v36 = vpop.f32.mrf.mxu3  ;;  %v632_v21 = vadd.f32 %v1717_v42, %v1702_v33 }
  0xaa   : > { %v1706_v37 = vpop.f32.mrf.mxu0  ;;  %v682_v51 = vadd.f32 %v1717_v42, %v681_v36 }
  0xab   : > { %v754_v27 = vmax.f32 %v632_v21, 0.0 }
  0xac   : > { %v774_v56 = vmax.f32 %v682_v51, 0.0 }
  0xad   : > { %1317 = vmatmul.msk.bf16.gmra.mxu0 %vm463_vm0, %v1421_v34  ;;  %1329 = vmatmul.msk.bf16.gmra.mxu2 %vm463_vm0, %v1433_v35 }
  0xae   : > { %1339 = vmatmul.msk.bf16.gmra.mxu3 %vm463_vm0, %v1443_v38 }
  0xb0   : > { %v634_v39 = vpop.f32.mrf.mxu2 }
  0xb1   : > { %v684_v40 = vpop.f32.mrf.mxu3  ;;  %v635_v19 = vadd.f32 %v1717_v42, %v634_v39 }
  0xb2   : > { %v1712_v41 = vpop.f32.mrf.mxu0  ;;  %v685_v47 = vadd.f32 %v1717_v42, %v684_v40 }
  0xb3   : > { %v755_v22 = vmax.f32 %v635_v19, 0.0 }
  0xb4   : > { %v775_v50 = vmax.f32 %v685_v47, 0.0 }
  0xb8   : > { %v636_v43 = vpop.f32.mrf.mxu2 }
  0xb9   : > { %v686_v45 = vpop.f32.mrf.mxu3  ;;  %v637_v14 = vadd.f32 %v1717_v42, %v636_v43 }
  0xba   : > { %v1720_v46 = vpop.f32.mrf.mxu0  ;;  %v687_v48 = vadd.f32 %v1717_v42, %v686_v45 }
  0xbb   : > { %v756_v20 = vmax.f32 %v637_v14, 0.0 }
  0xbc   : > { %v776_v49 = vmax.f32 %v687_v48, 0.0 }
  0xbd   : > { %1318 = vmatmul.msk.bf16.gmra.mxu0 %vm463_vm0, %v1422_v44 }
  0xbe   : > { %1374 = vmatpush.xpose.msk.msrb.mxu3 %vm463_vm0, %v776_v49 }
  0xc0   : > { %v639_v52 = vpop.f32.mrf.mxu2 }
  0xc1   : > { %v1727_v53 = vpop.f32.mrf.mxu3  ;;  %v640_v13 = vadd.f32 %v1717_v42, %v639_v52 }
  0xc2   : > { %v1729_v54 = vpop.f32.mrf.mxu0  ;;  %1375 = vmatpush.xpose.msk.msrb.mxu3 %vm463_vm0, %v775_v50 }
  0xc3   : > { %v757_v15 = vmax.f32 %v640_v13, 0.0 }
  0xc6   : > { %1376 = vmatpush.xpose.msk.msrb.mxu3 %vm463_vm0, %v774_v56 }
  0xc8   : > { %v641_v58 = vpop.f32.mrf.mxu2 }
  0xc9   : > { %v1735_v60 = vpop.f32.mrf.mxu3  ;;  %v642_v7 = vadd.f32 %v1717_v42, %v641_v58 }
  0xca   : > { %v1737_v61 = vpop.f32.mrf.mxu0  ;;  %1377 = vmatpush.xpose.msk.msrb.mxu3 %vm463_vm0, %v773_v57 }
  0xcb   : > { %v758_v10 = vmax.f32 %v642_v7, 0.0 }
  0xcd   : > { %1319 = vmatmul.msk.bf16.gmra.mxu0 %vm463_vm0, %v1423_v59 }
  0xd0   : > { %v644_v62 = vpop.f32.mrf.mxu2 }
  0xd1   : > { %v1741_v63 = vpop.f32.mrf.mxu3  ;;  %v645_v2 = vadd.f32 %v1717_v42, %v644_v62 }
  0xd2   : > { %v1743_v0 = vpop.f32.mrf.mxu0 }
  0xd3   : > { %v759_v8 = vmax.f32 %v645_v2, 0.0 }
  0xd8   : > { %v646_v1 = vpop.f32.mrf.mxu2 }
  0xd9   : > { %v647_v3 = vadd.f32 %v1717_v42, %v646_v1  ;;  %v1747_v4 = vpop.f32.mrf.mxu3 }
  0xda   : > { %v1749_v5 = vpop.f32.mrf.mxu0 }
  0xdb   : > { %v760_v6 = vmax.f32 %v647_v3, 0.0  ;;  %v590_v14 = vadd.f32 %v1717_v42, %v1749_v5 }
  0xdd   : > { %1357 = vmatpush.xpose.msk.msrb.mxu2 %vm463_vm0, %v760_v6  ;;  %v737_v21 = vmax.f32 %v590_v14, 0.0 }
  0xe0   : > { %v1753_v9 = vpop.f32.mrf.mxu2 }
  0xe1   : > { %1358 = vmatpush.xpose.msk.msrb.mxu2 %vm463_vm0, %v759_v8  ;;  %v1756_v11 = vpop.f32.mrf.mxu3 }
  0xe2   : > { %v591_v12 = vpop.f32.mrf.mxu0 }
  0xe3   : > { %v592_v8 = vadd.f32 %v1717_v42, %v591_v12  ;;  %v585_v12 = vadd.f32 %v1717_v42, %v1737_v61  ;;  %v580_v61 = vadd.f32 %v1717_v42, %v1720_v46  ;;  %v575_v46 = vadd.f32 %v1717_v42, %v1706_v37 }
  0xe5   : > { %1359 = vmatpush.xpose.msk.msrb.mxu2 %vm463_vm0, %v758_v10 }
  0xe8   : > { %v1761_v16 = vpop.f32.mrf.mxu2 }
  0xe9   : > { %1360 = vmatpush.xpose.msk.msrb.mxu2 %vm463_vm0, %v757_v15  ;;  %v1764_v17 = vpop.f32.mrf.mxu3  ;;  %v738_v15 = vmax.f32 %v592_v8, 0.0 }
  0xea   : > { %v594_v18 = vpop.f32.mrf.mxu0 }
  0xeb   : > { %v595_v3 = vadd.f32 %v1717_v42, %v594_v18 }
  0xed   : > { %1361 = vmatpush.xpose.msk.msrb.mxu2 %vm463_vm0, %v756_v20  ;;  %v739_v10 = vmax.f32 %v595_v3, 0.0  ;;  %v587_v20 = vadd.f32 %v1717_v42, %v1743_v0 }
  0xf0   : > { %v1770_v23 = vpop.f32.mrf.mxu2 }
  0xf1   : > { %1362 = vmatpush.xpose.msk.msrb.mxu2 %vm463_vm0, %v755_v22  ;;  %v1773_v24 = vpop.f32.mrf.mxu3 }
  0xf2   : > { %v596_v25 = vpop.f32.mrf.mxu0 }
  0xf3   : > { %v597_v59 = vadd.f32 %v1717_v42, %v596_v25  ;;  %v736_v25 = vmax.f32 %v587_v20, 0.0 }
  0xf5   : > { %1363 = vmatpush.xpose.msk.msrb.mxu2 %vm463_vm0, %v754_v27  ;;  %v740_v6 = vmax.f32 %v597_v59, 0.0  ;;  %v582_v27 = vadd.f32 %v1717_v42, %v1729_v54  ;;  %v577_v54 = vadd.f32 %v1717_v42, %v1712_v41  ;;  %v572_v41 = vadd.f32 %v1717_v42, %v1700_v32 }
  0xf7   : > { %v732_v59 = vmax.f32 %v577_v54, 0.0 }
  0xf8   : > { %v1778_v31 = vpop.f32.mrf.mxu2 }
  0xf9   : > { %1364 = vmatpush.xpose.msk.msrb.mxu2 %vm463_vm0, %v753_v29  ;;  %v1781_v34 = vpop.f32.mrf.mxu3  ;;  %v735_v29 = vmax.f32 %v585_v12, 0.0 }
  0xfa   : > { %v599_v33 = vpop.f32.mrf.mxu0 }
  0xfb   : > { %v600_v56 = vadd.f32 %v1717_v42, %v599_v33 }
  0xfd   : > { %v741_v62 = vmax.f32 %v600_v56, 0.0 }
 0x100   : > { %v1783_v35 = vpop.f32.mrf.mxu2 }
 0x101   : > { %v1785_v38 = vpop.f32.mrf.mxu3 }
 0x102   : > { %v601_v36 = vpop.f32.mrf.mxu0 }
 0x103   : > { %v602_v50 = vadd.f32 %v1717_v42, %v601_v36 }
 0x105   : > { %v742_v57 = vmax.f32 %v602_v50, 0.0 }
 0x108   : > { %v1787_v39 = vpop.f32.mrf.mxu2 }
 0x109   : > { %v1789_v30 = vpop.f32.mrf.mxu3  ;;  %v662_v32 = vadd.f32 %v1717_v42, %v1787_v39 }
 0x10a   : > { %v604_v40 = vpop.f32.mrf.mxu0 }
 0x10b   : > { %v605_v47 = vadd.f32 %v1717_v42, %v604_v40  ;;  %v766_v12 = vmax.f32 %v662_v32, 0.0  ;;  %v692_v32 = vadd.f32 %v1717_v42, %v1735_v60 }
 0x10d   : > { %v743_v51 = vmax.f32 %v605_v47, 0.0 }
 0x110   : > { %v1791_v43 = vpop.f32.mrf.mxu2 }
 0x111   : > { %v1797_v52 = vpop.f32.mrf.mxu3 }
 0x112   : > { %v606_v44 = vpop.f32.mrf.mxu0 }
 0x113   : > { %v607_v45 = vadd.f32 %v1717_v42, %v606_v44  ;;  %v734_v44 = vmax.f32 %v582_v27, 0.0 }
 0x115   : > { %v744_v48 = vmax.f32 %v607_v45, 0.0 }
 0x117   : > { %1340 = vmatpush.xpose.msk.msra.mxu1 %vm463_vm0, %v744_v48  ;;  %v733_v48 = vmax.f32 %v580_v61, 0.0 }
 0x118   : > { %v666_v49 = vpop.f32.mrf.mxu2 }
 0x119   : > { %v1808_v2 = vpop.f32.mrf.mxu3 }
 0x11a   : > { %v1799_v55 = vpop.f32.mrf.mxu0  ;;  %v717_v54 = vadd.f32 %v1717_v42, %v1808_v2  ;;  %v650_v2 = vadd.f32 %v1717_v42, %v1753_v9  ;;  %v712_v9 = vadd.f32 %v1717_v42, %v1789_v30 }
 0x11b   : > { %1341 = vmatpush.xpose.msk.msra.mxu1 %vm463_vm0, %v743_v51  ;;  %v610_v30 = vadd.f32 %v1717_v42, %v1799_v55  ;;  %v702_v55 = vadd.f32 %v1717_v42, %v1764_v17  ;;  %v695_v17 = vadd.f32 %v1717_v42, %v1741_v63 }
 0x11f   : > { %1342 = vmatpush.xpose.msk.msra.mxu1 %vm463_vm0, %v742_v57 }
 0x120   : > { %v669_v58 = vpop.f32.mrf.mxu2 }
 0x121   : > { %v1818_v19 = vpop.f32.mrf.mxu3  ;;  %v670_v57 = vadd.f32 %v1717_v42, %v669_v58 }
 0x122   : > { %v1805_v1 = vpop.f32.mrf.mxu0  ;;  %v720_v61 = vadd.f32 %v1717_v42, %v1818_v19  ;;  %v652_v19 = vadd.f32 %v1717_v42, %v1761_v16  ;;  %v793_v16 = vld [vmem:[%s1989_s3 + $0x1] sm:$0x1] }
 0x123   : > { %1343 = vmatpush.xpose.msk.msra.mxu1 %vm463_vm0, %v741_v62  ;;  %v667_v62 = vadd.f32 %v1717_v42, %v666_v49  ;;  %v769_v3 = vmax.f32 %v670_v57, 0.0  ;;  %v570_v49 = vadd.f32 %v1717_v42, %v1692_v28  ;;  %v660_v28 = vadd.f32 %v1717_v42, %v1783_v35 }
 0x124   : > { %v762_v57 = vmax.f32 %v652_v19, 0.0 }
 0x125   : > { %v768_v8 = vmax.f32 %v667_v62, 0.0  ;;  %v612_v62 = vadd.f32 %v1717_v42, %v1805_v1  ;;  %v707_v1 = vadd.f32 %v1717_v42, %v1781_v34  ;;  %v700_v34 = vadd.f32 %v1717_v42, %v1756_v11 }
 0x126   : > { %v779_v11 = vmax.f32 %v695_v17, 0.0 }
 0x127   : > { %1344 = vmatpush.xpose.msk.msra.mxu1 %vm463_vm0, %v740_v6  ;;  %v731_v6 = vmax.f32 %v575_v46, 0.0 }
 0x128   : > { %v671_v7 = vpop.f32.mrf.mxu2 }
 0x129   : > { %v721_v5 = vpop.f32.mrf.mxu3  ;;  %v672_v45 = vadd.f32 %v1717_v42, %v671_v7  ;;  %v665_v7 = vadd.f32 %v1717_v42, %v1791_v43 }
 0x12a   : > { %v1813_v13 = vpop.f32.mrf.mxu0  ;;  %v722_v27 = vadd.f32 %v1717_v42, %v721_v5  ;;  %v655_v5 = vadd.f32 %v1717_v42, %v1770_v23 }
 0x12b   : > { %1345 = vmatpush.xpose.msk.msra.mxu1 %vm463_vm0, %v739_v10  ;;  %v770_v50 = vmax.f32 %v672_v45, 0.0  ;;  %v730_v10 = vmax.f32 %v572_v41, 0.0  ;;  %v786_v41 = vmax.f32 %v712_v9, 0.0 }
 0x12f   : > { %1346 = vmatpush.xpose.msk.msra.mxu1 %vm463_vm0, %v738_v15  ;;  %v767_v15 = vmax.f32 %v665_v7, 0.0  ;;  %v705_v7 = vadd.f32 %v1717_v42, %v1773_v24  ;;  %v697_v24 = vadd.f32 %v1717_v42, %v1747_v4  ;;  %v690_v4 = vadd.f32 %v1717_v42, %v1727_v53 }
 0x130   : > { %v674_v18 = vpop.f32.mrf.mxu2  ;;  %v1085_v53 = vlaneseq }
 0x131   : > { %v675_v33 = vadd.f32 %v1717_v42, %v674_v18  ;;  %v724_v51 = vpop.f32.mrf.mxu3  ;;  %v729_v18 = vmax.f32 %v570_v49, 0.0  ;;  %v782_v49 = vmax.f32 %v702_v55, 0.0 }
 0x132   : > { %v1823_v22 = vpop.f32.mrf.mxu0  ;;  %v725_v43 = vadd.f32 %v1717_v42, %v724_v51  ;;  %vm1087_vm4 = vcmp.lt.s32.totalorder %v1085_v53, 512 }
 0x133   : > { %1347 = vmatpush.xpose.msk.msra.mxu1 %vm463_vm0, %v737_v21  ;;  %v771_v47 = vmax.f32 %v675_v33, 0.0  ;;  %v657_v33 = vadd.f32 %v1717_v42, %v1778_v31  ;;  %v617_v23 = vadd.f32 %v1717_v42, %v1823_v22  ;;  %v615_v22 = vadd.f32 %v1717_v42, %v1813_v13 }
 0x134   : > { %v710_v13 = vadd.f32 %v1717_v42, %v1785_v38  ;;  %v745_v38 = vmax.f32 %v610_v30, 0.0 }
 0x135   : > { %v764_v45 = vmax.f32 %v657_v33, 0.0  ;;  %v748_v46 = vmax.f32 %v617_v23, 0.0 }
 0x137   : > { %1348 = vmatpush.xpose.msk.msra.mxu1 %vm463_vm0, %v736_v25 }
 0x138   : > { %v676_v26 = vpop.f32.mrf.mxu2 }
 0x139   : > { %v677_v0 = vadd.f32 %v1717_v42, %v676_v26  ;;  %v726_v37 = vpop.f32.mrf.mxu3 }
 0x13a   : > { %v1833_v36 = vpop.f32.mrf.mxu0  ;;  %v727_v14 = vadd.f32 %v1717_v42, %v726_v37  ;;  %v783_v37 = vmax.f32 %v705_v7, 0.0 }
 0x13b   : > { %v772_v40 = vmax.f32 %v677_v0, 0.0  ;;  %1349 = vmatpush.xpose.msk.msra.mxu1 %vm463_vm0, %v735_v29  ;;  %v791_v29 = vmax.f32 %v725_v43, 0.0  ;;  %v765_v0 = vmax.f32 %v660_v28, 0.0  ;;  %v620_v31 = vadd.f32 %v1717_v42, %v1833_v36 }
 0x13c   : > { %v792_v20 = vmax.f32 %v727_v14, 0.0  ;;  %v715_v36 = vadd.f32 %v1717_v42, %v1797_v52  ;;  %v780_v14 = vmax.f32 %v697_v24, 0.0  ;;  %v795_v43 = vstv %s794_s15 }
 0x13d   : > { %1378 = vmatpush.xpose.msk.msrb.mxu3 %vm463_vm0, %v772_v40  ;;  %v749_v51 = vmax.f32 %v620_v31, 0.0 }
 0x13e   : > { %v787_v52 = vmax.f32 %v715_v36, 0.0 }
 0x13f   : > { %1350 = vmatpush.xpose.msk.msra.mxu1 %vm463_vm0, %v734_v44  ;;  %v790_v44 = vmax.f32 %v722_v27, 0.0 }
 0x141   : > { %1379 = vmatpush.xpose.msk.msrb.mxu3 %vm463_vm0, %v771_v47 }
 0x142   : > { %v621_v56 = vpop.f32.mrf.mxu0 }
 0x143   : > { %1351 = vmatpush.xpose.msk.msra.mxu1 %vm463_vm0, %v733_v48  ;;  %v622_v40 = vadd.f32 %v1717_v42, %v621_v56  ;;  %v789_v48 = vmax.f32 %v720_v61, 0.0  ;;  %v788_v56 = vmax.f32 %v717_v54, 0.0 }
 0x145   : > { %1380 = vmatpush.xpose.msk.msrb.mxu3 %vm463_vm0, %v770_v50  ;;  %v750_v47 = vmax.f32 %v622_v40, 0.0  ;;  %v763_v50 = vmax.f32 %v655_v5, 0.0 }
 0x147   : > { %1352 = vmatpush.xpose.msk.msra.mxu1 %vm463_vm0, %v732_v59  ;;  %v761_v59 = vmax.f32 %v650_v2, 0.0 }
 0x149   : > { %1381 = vmatpush.xpose.msk.msrb.mxu3 %vm463_vm0, %v769_v3  ;;  %v747_v3 = vmax.f32 %v615_v22, 0.0 }
 0x14a   : > { %v624_v58 = vpop.f32.mrf.mxu0 }
 0x14b   : > { %1353 = vmatpush.xpose.msk.msra.mxu1 %vm463_vm0, %v731_v6  ;;  %v625_v25 = vadd.f32 %v1717_v42, %v624_v58  ;;  %v746_v6 = vmax.f32 %v612_v62, 0.0  ;;  %v785_v58 = vmax.f32 %v710_v13, 0.0 }
 0x14d   : > { %1382 = vmatpush.xpose.msk.msrb.mxu3 %vm463_vm0, %v768_v8  ;;  %v751_v35 = vmax.f32 %v625_v25, 0.0  ;;  %v784_v8 = vmax.f32 %v707_v1, 0.0 }
 0x14f   : > { %1354 = vmatpush.xpose.msk.msra.mxu1 %vm463_vm0, %v730_v10  ;;  %v781_v10 = vmax.f32 %v700_v34, 0.0 }
 0x151   : > { %1383 = vmatpush.xpose.msk.msrb.mxu3 %vm463_vm0, %v767_v15  ;;  %v778_v15 = vmax.f32 %v692_v32, 0.0 }
 0x152   : > { %v626_v21 = vpop.f32.mrf.mxu0 }
 0x153   : > { %v627_v26 = vadd.f32 %v1717_v42, %v626_v21  ;;  %1355 = vmatpush.xpose.msk.msra.mxu1 %vm463_vm0, %v729_v18  ;;  %v777_v18 = vmax.f32 %v690_v4, 0.0 }
 0x155   : > { %v752_v39 = vmax.f32 %v627_v26, 0.0  ;;  %1384 = vmatpush.xpose.msk.msrb.mxu3 %vm463_vm0, %v766_v12 }
 0x156   : > { %1356 = vmatmul.msk.f32.vlgmr.msra.gmra.mxu1 %vm463_vm0, %v793_v16 }
 0x157   : > { %1391 = vmatpush.xpose.msk.msrb.mxu1 %vm463_vm0, %v792_v20  ;;  %1365 = vmatpush.xpose.msk.msrb.mxu2 %vm463_vm0, %v752_v39 }
 0x159   : > { %1385 = vmatpush.xpose.msk.msrb.mxu3 %vm463_vm0, %v765_v0 }
 0x15b   : > { %1392 = vmatpush.xpose.msk.msrb.mxu1 %vm463_vm0, %v791_v29  ;;  %1366 = vmatpush.xpose.msk.msrb.mxu2 %vm463_vm0, %v751_v35 }
 0x15d   : > { %1386 = vmatpush.xpose.msk.msrb.mxu3 %vm463_vm0, %v764_v45 }
 0x15f   : > { %1393 = vmatpush.xpose.msk.msrb.mxu1 %vm463_vm0, %v790_v44  ;;  %1367 = vmatpush.xpose.msk.msrb.mxu2 %vm463_vm0, %v750_v47 }
 0x161   : > { %1387 = vmatpush.xpose.msk.msrb.mxu3 %vm463_vm0, %v763_v50 }
 0x163   : > { %1394 = vmatpush.xpose.msk.msrb.mxu1 %vm463_vm0, %v789_v48  ;;  %1368 = vmatpush.xpose.msk.msrb.mxu2 %vm463_vm0, %v749_v51 }
 0x165   : > { %1388 = vmatpush.xpose.msk.msrb.mxu3 %vm463_vm0, %v762_v57 }
 0x167   : > { %1395 = vmatpush.xpose.msk.msrb.mxu1 %vm463_vm0, %v788_v56  ;;  %1369 = vmatpush.xpose.msk.msrb.mxu2 %vm463_vm0, %v748_v46 }
 0x169   : > { %1389 = vmatpush.xpose.msk.msrb.mxu3 %vm463_vm0, %v761_v59 }
 0x16b   : > { %1396 = vmatpush.xpose.msk.msrb.mxu1 %vm463_vm0, %v787_v52  ;;  %1370 = vmatpush.xpose.msk.msrb.mxu2 %vm463_vm0, %v747_v3 }
 0x16c   : > { %1390 = vmatmul.msk.f32.vlgmr.msrb.gmra.mxu3 %vm463_vm0, %v793_v16 }
 0x16f   : > { %1397 = vmatpush.xpose.msk.msrb.mxu1 %vm463_vm0, %v786_v41  ;;  %1371 = vmatpush.xpose.msk.msrb.mxu2 %vm463_vm0, %v746_v6 }
 0x173   : > { %1398 = vmatpush.xpose.msk.msrb.mxu1 %vm463_vm0, %v785_v58  ;;  %1372 = vmatpush.xpose.msk.msrb.mxu2 %vm463_vm0, %v745_v38 }
 0x176   : > { %1373 = vmatmul.msk.f32.vlgmr.msrb.gmra.mxu2 %vm463_vm0, %v793_v16 }
 0x177   : > { %1399 = vmatpush.xpose.msk.msrb.mxu1 %vm463_vm0, %v784_v8 }
 0x17b   : > { %1400 = vmatpush.xpose.msk.msrb.mxu1 %vm463_vm0, %v783_v37 }
 0x17f   : > { %1401 = vmatpush.xpose.msk.msrb.mxu1 %vm463_vm0, %v782_v49 }
 0x183   : > { %1402 = vmatpush.xpose.msk.msrb.mxu1 %vm463_vm0, %v781_v10 }
 0x187   : > { %1403 = vmatpush.xpose.msk.msrb.mxu1 %vm463_vm0, %v780_v14 }
 0x18b   : > { %1404 = vmatpush.xpose.msk.msrb.mxu1 %vm463_vm0, %v779_v11 }
 0x18f   : > { %1405 = vmatpush.xpose.msk.msrb.mxu1 %vm463_vm0, %v778_v15 }
 0x193   : > { %1406 = vmatpush.xpose.msk.msrb.mxu1 %vm463_vm0, %v777_v18 }
 0x196   : > { %1407 = vmatmul.msk.f32.vlgmr.msrb.gmra.mxu1 %vm463_vm0, %v793_v16 }
 0x1d3   : > { %v1008_v63 = vpop.f32.mrf.mxu1 }
 0x1d4   : > { %v1009_v12 = vadd.f32 %v1008_v63, %v795_v43 }
 0x1ef   : > { %v1048_v20 = vpop.f32.mrf.mxu3 }
 0x1f0   : > { %v1049_v28 = vadd.f32 %v1048_v20, %v795_v43 }
 0x1f2   : > { %v1076_v26 = vrot.slane %v1049_v28, 6 }
 0x1f9   : > { %v1028_v60 = vpop.f32.mrf.mxu2 }
 0x1fa   : > { %v1029_v21 = vadd.f32 %v1028_v60, %v795_v43 }
 0x1fc   : > { %v1075_v25 = vrot.slane %v1029_v21, 7 }
 0x1fe   : > { %v1079_v29 = vsel %vm1078_vm1, %v1009_v12, %v1075_v25 }
 0x213   : > { %v1068_v42 = vpop.f32.mrf.mxu1 }
 0x214   : > { %v1069_v39 = vadd.f32 %v1068_v42, %v795_v43 }
 0x216   : > { %v1077_v27 = vrot.slane %v1069_v39, 5 }
 0x218   : > { %v1081_v33 = vsel %vm1080_vm2, %v1076_v26, %v1077_v27 }
 0x219   : > { %v1083_v0 = vsel %vm1082_vm3, %v1079_v29, %v1081_v33 }
 0x21a   : > { %1089 = vst.msk [vmem:[%s204_s30] sm:$0xf] %vm1087_vm4, %v1083_v0 }
 0x21b   : > { %1517 = shalt.err (!%p1514_p3)
}
 0x21c   : > { %1450 = dma.vmem_to_hbm [thread:$0]  (%p1620_p5), %s1104_s5, 64, %s1106_s6, %s1091_s0  }
 0x21d PF: > { %p1456_p4 = scmp.ge.s32.totalorder %s1552_s20, 2  ;;  %s1117_s14 = sand.u32 1, %s1540_s17  }
 0x21e   : > { %s1118_s15 = scalar_lea.sflag [#allocation4], %s1117_s14 }
 0x21f   : > { %p1453_p7 = pnand %p1456_p4, %p1624_p6 }
 0x221   : > { %p1454_p8 = pneg %p1453_p7 }
 0x223   : > { %1535 = dma.done.wait (%p1454_p8), %s1118_s15, 64  }
 0x224   : > { %1537 = vsyncadd (%p1454_p8), %s1118_s15, 4294967232  ;;  %p15_p9 = scmp.ge.s32.totalorder %s1607_s22, 4   ;;  %s1993_s17 = smov %s1544_s18 }
 0x225   : > { %s1994_s18 = smov %s1548_s19  ;;  %s1995_s19 = smov %s1618_s25 }
 0x226   : > { %s1996_s20 = smov %s1607_s22  ;;  %17 = sbr.rel (!%p15_p9) target bundleno = 5 (0x5), region = 71 }
 0x22b   :  { %1124 = vsyncpa [#allocation4], 1 }
 0x22c   :  { %1126 = vsyncpa [#allocation4 + $0x1], 1 }

</bundles_post_ra>
